<compile_context>
chip_gen: v6e
topology: v6e:2x2x1
jax: 0.10.0
libtpu: 0.0.40
codegen_flags: <defaults>
</compile_context>

<pallas_src>
import functools

import jax
import jax.numpy as jnp
from jax.experimental import pallas as pl
from jax.experimental.pallas import tpu as pltpu


def _round_up(n: int, m: int) -> int:
    return ((n + m - 1) // m) * m


def _sublane_multiple(dtype) -> int:
    # f32 -> 8, bf16 -> 16, int8/fp8 -> 32 (packed sublanes).
    itemsize = jnp.dtype(dtype).itemsize
    return max(8, 32 // max(itemsize, 1))


@functools.lru_cache(maxsize=None)
def _vmem_budget_bytes() -> int:
    """Per-generation VMEM budget with ~25% headroom for compiler scratch."""
    cap = None
    try:
        info = pltpu.get_tpu_info()
        cap = getattr(info, "vmem_capacity_bytes", None)
    except Exception:
        cap = None
    if not cap:
        cap = 64 * 1024 * 1024  # conservative default: v7x per-TensorCore VMEM
    return int(cap) * 3 // 4


def _probe_kernel(x_ref, o_ref):
    o_ref[...] = x_ref[...] + 1.0


@functools.lru_cache(maxsize=None)
def _buffered_weights_supported() -> bool:
    """One-time probe: can constant-index blocks be single-buffered?"""
    try:
        x = jnp.zeros((8, 128), jnp.float32)
        y = pl.pallas_call(
            _probe_kernel,
            out_shape=jax.ShapeDtypeStruct((16, 128), jnp.float32),
            grid=(2,),
            in_specs=[pl.BlockSpec((8, 128), lambda i: (0, 0),
                                   pipeline_mode=pl.Buffered(1))],
            out_specs=pl.BlockSpec((8, 128), lambda i: (i, 0)),
        )(x)
        jax.block_until_ready(y)
        return bool(jnp.all(y == 1.0))
    except Exception:
        return False


def _resident_spec(block_shape, single_buffer: bool) -> pl.BlockSpec:
    """BlockSpec for a block whose index never changes across the grid."""
    if single_buffer:
        return pl.BlockSpec(block_shape, lambda i: (0, 0),
                            pipeline_mode=pl.Buffered(1))
    return pl.BlockSpec(block_shape, lambda i: (0, 0))


def _mlp_fused_kernel(*refs, n_layers: int):
    """Fused MLP on one batch tile.

    refs = (x_ref, w0_ref, b0_ref, w1_ref, b1_ref, ..., o_ref)
      x_ref : [TILE_B, P0]    wi_ref : [P_i, P_{i+1}]
      bi_ref: [1, P_{i+1}]    o_ref  : [TILE_B, P_L]
    """
    x_ref = refs[0]
    o_ref = refs[-1]

    h = x_ref[...]                                   # weight dtype -> MXU
    for i in range(n_layers):
        w = refs[1 + 2 * i][...]
        b = refs[2 + 2 * i][...].astype(jnp.float32)
        h = jnp.dot(h, w, preferred_element_type=jnp.float32) + b
        if i < n_layers - 1:
            # SiLU(h) = h * sigmoid(h); exp + approx reciprocal both run on
            # the EUP slot (idle in a matmul-dominated bundle), avoiding a
            # VPU divide.
            h = h * pl.reciprocal(1.0 + jnp.exp(-h), approx=True)
            nxt_dtype = refs[1 + 2 * (i + 1)].dtype
            if nxt_dtype != h.dtype:
                h = h.astype(nxt_dtype)              # feed next MXU at full rate
    o_ref[...] = h.astype(o_ref.dtype)


def prepare_mlp_params(params, param_dtype=None):
    """Pad (and optionally cast) weights/biases ONCE; reuse across forwards.

    params: list of (W_T [in, out], b [out]) per layer.
    Returns a dict with padded params, logical dims and padded (lane) dims.
    """
    dims = [params[0][0].shape[0]] + [w_t.shape[1] for (w_t, _) in params]
    pdims = [_round_up(d, 128) for d in dims]
    padded = []
    for li, (w_t, b) in enumerate(params):
        if param_dtype is not None:
            w_t = w_t.astype(param_dtype)
            b = b.astype(param_dtype)
        wp = jnp.pad(w_t, ((0, pdims[li] - dims[li]),
                           (0, pdims[li + 1] - dims[li + 1])))
        bp = jnp.pad(b, (0, pdims[li + 1] - dims[li + 1])).reshape(1, pdims[li + 1])
        padded.append((wp, bp))
    return {"padded": padded, "dims": dims, "pdims": pdims}


def mlp_forward(x, prepared, tile_b: int = 1024):
    """Forward pass of the MLP via one fused Pallas kernel.

    `prepared` comes from prepare_mlp_params() (padding done once, not per call).
    """
    padded = prepared["padded"]
    dims = prepared["dims"]
    pdims = prepared["pdims"]
    n_layers = len(padded)

    orig_shape = x.shape
    x2 = x.reshape(-1, dims[0])
    B = x2.shape[0]

    compute_dtype = padded[0][0].dtype            # align activations with weights
    out_dtype = x.dtype
    sub = _sublane_multiple(compute_dtype)

    # --- VMEM budgeting ------------------------------------------------------
    single_buffer = _buffered_weights_supported()
    param_buffers = 1 if single_buffer else 2
    param_bytes = param_buffers * sum(
        int(w.size) * w.dtype.itemsize + int(b.size) * b.dtype.itemsize
        for (w, b) in padded)

    vmem_budget = _vmem_budget_bytes()
    act_itemsize = jnp.dtype(compute_dtype).itemsize
    out_itemsize = jnp.dtype(out_dtype).itemsize
    # Per batch-row bytes: double-buffered x block + double-buffered out block
    # + f32 intermediates for every hidden/output width; 1.5x slack for copies.
    per_row = (2 * pdims[0] * act_itemsize
               + 2 * pdims[-1] * out_itemsize
               + 4 * sum(pdims[1:]))
    per_row = int(per_row * 1.5)

    avail = vmem_budget - param_bytes
    if avail <= per_row * sub:
        # TODO(synk): weights too large to stay VMEM-resident (likely on v7x's
        # 64 MiB) -- stream weights per layer (grid axis over layers or
        # emit_pipeline over K-chunks) instead of the all-resident design.
        avail = max(vmem_budget // 4, per_row * sub)
    tile_max = max(sub, (avail // per_row) // sub * sub)
    tile_req = max(sub, min(_round_up(tile_b, sub), tile_max))

    # --- adaptive batch tiling ------------------------------------------------
    n_tiles = pl.cdiv(B, tile_req)
    if B >= 2 * sub:
        n_tiles = max(n_tiles, 2)       # >=2 grid steps so both v7x TCs get work
    tile = _round_up(pl.cdiv(B, n_tiles), sub)
    n_tiles = pl.cdiv(B, tile)          # keep batch padding minimal
    b_pad = tile * n_tiles

    # --- inputs / specs --------------------------------------------------------
    x_p = jnp.pad(x2.astype(compute_dtype),
                  ((0, b_pad - B), (0, pdims[0] - dims[0])))

    flat_inputs = [x_p]
    in_specs = [pl.BlockSpec((tile, pdims[0]), lambda i: (i, 0))]
    for li, (wp, bp) in enumerate(padded):
        flat_inputs += [wp, bp]
        in_specs.append(_resident_spec((pdims[li], pdims[li + 1]), single_buffer))
        in_specs.append(_resident_spec((1, pdims[li + 1]), single_buffer))
    out_spec = pl.BlockSpec((tile, pdims[-1]), lambda i: (i, 0))

    flops = 2 * b_pad * sum(pdims[j] * pdims[j + 1] for j in range(n_layers))
    transcendentals = 2 * b_pad * sum(pdims[1:-1])      # exp + recip per hidden
    bytes_accessed = (sum(int(a.size) * a.dtype.itemsize for a in flat_inputs)
                      + b_pad * pdims[-1] * out_itemsize)

    kernel = functools.partial(_mlp_fused_kernel, n_layers=n_layers)
    out_p = pl.pallas_call(
        kernel,
        out_shape=jax.ShapeDtypeStruct((b_pad, pdims[-1]), out_dtype),
        grid=(n_tiles,),
        in_specs=in_specs,
        out_specs=out_spec,
        compiler_params=pltpu.CompilerParams(
            dimension_semantics=("parallel",),
            vmem_limit_bytes=vmem_budget,
        ),
        cost_estimate=pl.CostEstimate(
            flops=int(flops),
            transcendentals=int(transcendentals),
            bytes_accessed=int(bytes_accessed),
        ),
    )(*flat_inputs)

    out = out_p[:B, : dims[-1]]
    return out.reshape(orig_shape[:-1] + (dims[-1],))


def init_mlp_params(key, dims):
    """Init matching nn.Linear's default (uniform +/- 1/sqrt(fan_in))."""
    params = []
    for i in range(len(dims) - 1):
        fan_in, fan_out = dims[i], dims[i + 1]
        key, kw, kb = jax.random.split(key, 3)
        bound = 1.0 / jnp.sqrt(fan_in)
        # stored directly as W^T: [in, out]
        w_t = jax.random.uniform(kw, (fan_in, fan_out), jnp.float32, -bound, bound)
        b = jax.random.uniform(kb, (fan_out,), jnp.float32, -bound, bound)
        params.append((w_t, b))
    return params


def mlp_reference(x, params):
    """Pure-JAX f32 reference for sanity checking."""
    x2 = x.reshape(-1, x.shape[-1])
    n_layers = len(params)
    for i, (w_t, b) in enumerate(params):
        x2 = x2 @ w_t + b
        if i < n_layers - 1:
            x2 = x2 * jax.nn.sigmoid(x2)
    return x2.reshape(x.shape[:-1] + (params[-1][0].shape[1],))


if __name__ == "__main__":
    key = jax.random.PRNGKey(0)
    dims = [16, 32, 64, 8]   # MLP(dims): Linear(16,32) SiLU Linear(32,64) SiLU Linear(64,8)

    kx, kp, kx2, kx3 = jax.random.split(key, 4)
    params = init_mlp_params(kp, dims)
    prepared = prepare_mlp_params(params)          # pad once, reuse across calls

    # Case 1: tiny batch -> single grid step.
    x = jax.random.normal(kx, (8, dims[0]), jnp.float32)
    out = jax.block_until_ready(mlp_forward(x, prepared))
    ref = mlp_reference(x, params)
    assert out.shape == (8, dims[-1])
    assert jnp.allclose(out, ref, atol=5e-3, rtol=5e-3), \
        float(jnp.max(jnp.abs(out - ref)))

    # Case 2: non-multiple batch -> adaptive tiling, 2 "parallel" grid steps.
    x2 = jax.random.normal(kx2, (300, dims[0]), jnp.float32)
    out2 = jax.block_until_ready(mlp_forward(x2, prepared))
    ref2 = mlp_reference(x2, params)
    assert out2.shape == (300, dims[-1])
    assert jnp.allclose(out2, ref2, atol=5e-3, rtol=5e-3), \
        float(jnp.max(jnp.abs(out2 - ref2)))

    # Case 3: bf16 weights + activations (fast MXU path), leading dims flattened.
    prepared_bf16 = prepare_mlp_params(params, param_dtype=jnp.bfloat16)
    x3 = jax.random.normal(kx3, (2, 5, dims[0]), jnp.float32)
    out3 = jax.block_until_ready(mlp_forward(x3, prepared_bf16))
    ref3 = mlp_reference(x3, params)
    assert out3.shape == (2, 5, dims[-1])
    assert jnp.allclose(out3, ref3, atol=1e-1, rtol=1e-1), \
        float(jnp.max(jnp.abs(out3 - ref3)))

    print("KERNEL_OK")
</pallas_src>

<mosaic_0001>
module attributes {stable_mosaic.version = 11 : i64} {
  func.func @_probe_kernel(%arg0: i32, %arg1: memref<8x128xf32, #tpu.memory_space<vmem>>, %arg2: memref<8x128xf32, #tpu.memory_space<vmem>>) attributes {dimension_semantics = [#tpu.dimension_semantics<arbitrary>], iteration_bounds = array<i64: 2>, scalar_prefetch = 0 : i64, scratch_operands = 0 : i64, tpu.core_type = #tpu.core_type<tc>, window_params = [{pipeline_mode = #tpu.pipeline_mode<synchronous>, transform_indices = @transform_0, window_bounds = array<i64: 8, 128>}, {transform_indices = @transform_1, window_bounds = array<i64: 8, 128>}]} {
    %c0 = arith.constant 0 : index
    %c0_0 = arith.constant 0 : index
    %0 = vector.load %arg1[%c0, %c0_0] : memref<8x128xf32, #tpu.memory_space<vmem>>, vector<8x128xf32>
    %cst = arith.constant 1.000000e+00 : f32
    %1 = vector.broadcast %cst : f32 to vector<8x128xf32>
    %2 = arith.addf %0, %1 : vector<8x128xf32>
    %c0_1 = arith.constant 0 : index
    %c0_2 = arith.constant 0 : index
    %3 = vector.load %arg2[%c0_1, %c0_2] : memref<8x128xf32, #tpu.memory_space<vmem>>, vector<8x128xf32>
    tpu.vector_store %arg2[%c0_1, %c0_2], %2 {strides = array<i32>} : memref<8x128xf32, #tpu.memory_space<vmem>>, vector<8x128xf32>,
    return
  }
  func.func @transform_0(%arg0: i32) -> (i32, i32) {
    %c0_i32 = arith.constant 0 : i32
    %c0_i32_0 = arith.constant 0 : i32
    %c0_i32_1 = arith.constant 0 : i32
    return %c0_i32, %c0_i32_0 : i32, i32
  }
  func.func @transform_1(%arg0: i32) -> (i32, i32) {
    %c0_i32 = arith.constant 0 : i32
    %c0_i32_0 = arith.constant 0 : i32
    return %arg0, %c0_i32 : i32, i32
  }
}

module attributes {stable_mosaic.version = 11 : i64} {
  func.func @_mlp_fused_kernel(%arg0: i32, %arg1: memref<8x128xf32, #tpu.memory_space<vmem>>, %arg2: memref<128x128xf32, #tpu.memory_space<vmem>>, %arg3: memref<1x128xf32, #tpu.memory_space<vmem>>, %arg4: memref<128x128xf32, #tpu.memory_space<vmem>>, %arg5: memref<1x128xf32, #tpu.memory_space<vmem>>, %arg6: memref<128x128xf32, #tpu.memory_space<vmem>>, %arg7: memref<1x128xf32, #tpu.memory_space<vmem>>, %arg8: memref<8x128xf32, #tpu.memory_space<vmem>>) attributes {dimension_semantics = [#tpu.dimension_semantics<parallel>], iteration_bounds = array<i64: 1>, scalar_prefetch = 0 : i64, scratch_operands = 0 : i64, tpu.core_type = #tpu.core_type<tc>, window_params = [{transform_indices = @transform_0, window_bounds = array<i64: 8, 128>}, {pipeline_mode = #tpu.pipeline_mode<synchronous>, transform_indices = @transform_1, window_bounds = array<i64: 128, 128>}, {pipeline_mode = #tpu.pipeline_mode<synchronous>, transform_indices = @transform_2, window_bounds = array<i64: 1, 128>}, {pipeline_mode = #tpu.pipeline_mode<synchronous>, transform_indices = @transform_3, window_bounds = array<i64: 128, 128>}, {pipeline_mode = #tpu.pipeline_mode<synchronous>, transform_indices = @transform_4, window_bounds = array<i64: 1, 128>}, {pipeline_mode = #tpu.pipeline_mode<synchronous>, transform_indices = @transform_5, window_bounds = array<i64: 128, 128>}, {pipeline_mode = #tpu.pipeline_mode<synchronous>, transform_indices = @transform_6, window_bounds = array<i64: 1, 128>}, {transform_indices = @transform_7, window_bounds = array<i64: 8, 128>}]} {
    %c0 = arith.constant 0 : index
    %c0_0 = arith.constant 0 : index
    %0 = vector.load %arg1[%c0, %c0_0] : memref<8x128xf32, #tpu.memory_space<vmem>>, vector<8x128xf32>
    %c0_1 = arith.constant 0 : index
    %c0_2 = arith.constant 0 : index
    %1 = vector.load %arg2[%c0_1, %c0_2] : memref<128x128xf32, #tpu.memory_space<vmem>>, vector<128x128xf32>
    %c0_3 = arith.constant 0 : index
    %c0_4 = arith.constant 0 : index
    %2 = vector.load %arg3[%c0_3, %c0_4] : memref<1x128xf32, #tpu.memory_space<vmem>>, vector<1x128xf32>
    %cst = arith.constant dense<0.000000e+00> : vector<8x128xf32>
    %3 = tpu.matmul %0, %1, %cst {dimension_numbers = #tpu.dot_dimension_numbers<[1], [0], [0], [1], [0, 0, 1, 1], [], []>} : vector<8x128xf32>, vector<128x128xf32>, vector<8x128xf32> -> vector<8x128xf32>
    %4 = vector.broadcast %2 : vector<1x128xf32> to vector<8x128xf32>
    %5 = arith.addf %3, %4 : vector<8x128xf32>
    %cst_5 = arith.constant 0.000000e+00 : f32
    %6 = vector.broadcast %cst_5 : f32 to vector<8x128xf32>
    %7 = arith.subf %6, %5 : vector<8x128xf32>
    %8 = math.exp %7 : vector<8x128xf32>
    %cst_6 = arith.constant 1.000000e+00 : f32
    %9 = vector.broadcast %cst_6 : f32 to vector<8x128xf32>
    %10 = arith.addf %9, %8 : vector<8x128xf32>
    %11 = tpu.reciprocal %10 {approx = true} : vector<8x128xf32> -> vector<8x128xf32>
    %12 = arith.mulf %5, %11 : vector<8x128xf32>
    %c0_7 = arith.constant 0 : index
    %c0_8 = arith.constant 0 : index
    %13 = vector.load %arg4[%c0_7, %c0_8] : memref<128x128xf32, #tpu.memory_space<vmem>>, vector<128x128xf32>
    %c0_9 = arith.constant 0 : index
    %c0_10 = arith.constant 0 : index
    %14 = vector.load %arg5[%c0_9, %c0_10] : memref<1x128xf32, #tpu.memory_space<vmem>>, vector<1x128xf32>
    %cst_11 = arith.constant dense<0.000000e+00> : vector<8x128xf32>
    %15 = tpu.matmul %12, %13, %cst_11 {dimension_numbers = #tpu.dot_dimension_numbers<[1], [0], [0], [1], [0, 0, 1, 1], [], []>} : vector<8x128xf32>, vector<128x128xf32>, vector<8x128xf32> -> vector<8x128xf32>
    %16 = vector.broadcast %14 : vector<1x128xf32> to vector<8x128xf32>
    %17 = arith.addf %15, %16 : vector<8x128xf32>
    %cst_12 = arith.constant 0.000000e+00 : f32
    %18 = vector.broadcast %cst_12 : f32 to vector<8x128xf32>
    %19 = arith.subf %18, %17 : vector<8x128xf32>
    %20 = math.exp %19 : vector<8x128xf32>
    %cst_13 = arith.constant 1.000000e+00 : f32
    %21 = vector.broadcast %cst_13 : f32 to vector<8x128xf32>
    %22 = arith.addf %21, %20 : vector<8x128xf32>
    %23 = tpu.reciprocal %22 {approx = true} : vector<8x128xf32> -> vector<8x128xf32>
    %24 = arith.mulf %17, %23 : vector<8x128xf32>
    %c0_14 = arith.constant 0 : index
    %c0_15 = arith.constant 0 : index
    %25 = vector.load %arg6[%c0_14, %c0_15] : memref<128x128xf32, #tpu.memory_space<vmem>>, vector<128x128xf32>
    %c0_16 = arith.constant 0 : index
    %c0_17 = arith.constant 0 : index
    %26 = vector.load %arg7[%c0_16, %c0_17] : memref<1x128xf32, #tpu.memory_space<vmem>>, vector<1x128xf32>
    %cst_18 = arith.constant dense<0.000000e+00> : vector<8x128xf32>
    %27 = tpu.matmul %24, %25, %cst_18 {dimension_numbers = #tpu.dot_dimension_numbers<[1], [0], [0], [1], [0, 0, 1, 1], [], []>} : vector<8x128xf32>, vector<128x128xf32>, vector<8x128xf32> -> vector<8x128xf32>
    %28 = vector.broadcast %26 : vector<1x128xf32> to vector<8x128xf32>
    %29 = arith.addf %27, %28 : vector<8x128xf32>
    %c0_19 = arith.constant 0 : index
    %c0_20 = arith.constant 0 : index
    %30 = vector.load %arg8[%c0_19, %c0_20] : memref<8x128xf32, #tpu.memory_space<vmem>>, vector<8x128xf32>
    tpu.vector_store %arg8[%c0_19, %c0_20], %29 {strides = array<i32>} : memref<8x128xf32, #tpu.memory_space<vmem>>, vector<8x128xf32>,
    return
  }
  func.func @transform_0(%arg0: i32) -> (i32, i32) {
    %c0_i32 = arith.constant 0 : i32
    %c0_i32_0 = arith.constant 0 : i32
    return %arg0, %c0_i32 : i32, i32
  }
  func.func @transform_1(%arg0: i32) -> (i32, i32) {
    %c0_i32 = arith.constant 0 : i32
    %c0_i32_0 = arith.constant 0 : i32
    %c0_i32_1 = arith.constant 0 : i32
    return %c0_i32, %c0_i32_0 : i32, i32
  }
  func.func @transform_2(%arg0: i32) -> (i32, i32) {
    %c0_i32 = arith.constant 0 : i32
    %c0_i32_0 = arith.constant 0 : i32
    %c0_i32_1 = arith.constant 0 : i32
    return %c0_i32, %c0_i32_0 : i32, i32
  }
  func.func @transform_3(%arg0: i32) -> (i32, i32) {
    %c0_i32 = arith.constant 0 : i32
    %c0_i32_0 = arith.constant 0 : i32
    %c0_i32_1 = arith.constant 0 : i32
    return %c0_i32, %c0_i32_0 : i32, i32
  }
  func.func @transform_4(%arg0: i32) -> (i32, i32) {
    %c0_i32 = arith.constant 0 : i32
    %c0_i32_0 = arith.constant 0 : i32
    %c0_i32_1 = arith.constant 0 : i32
    return %c0_i32, %c0_i32_0 : i32, i32
  }
  func.func @transform_5(%arg0: i32) -> (i32, i32) {
    %c0_i32 = arith.constant 0 : i32
    %c0_i32_0 = arith.constant 0 : i32
    %c0_i32_1 = arith.constant 0 : i32
    return %c0_i32, %c0_i32_0 : i32, i32
  }
  func.func @transform_6(%arg0: i32) -> (i32, i32) {
    %c0_i32 = arith.constant 0 : i32
    %c0_i32_0 = arith.constant 0 : i32
    %c0_i32_1 = arith.constant 0 : i32
    return %c0_i32, %c0_i32_0 : i32, i32
  }
  func.func @transform_7(%arg0: i32) -> (i32, i32) {
    %c0_i32 = arith.constant 0 : i32
    %c0_i32_0 = arith.constant 0 : i32
    return %arg0, %c0_i32 : i32, i32
  }
}

</mosaic_0001>

<bundles_post_ra>
// kernel: tpu_custom_call.1
= control target key start
LH: loop header
LB: loop body
LE: loop exit
PB: predicated region body
PF: predicated region fallthrough
CT: control target
= control target key end

     0   :  { %6 = vsyncpa [#allocation3], 0  ;;  %s448_s0 = inlined_call_operand.hbm [shape: f32[8,128], index: 0, kind: input, shape index: {}]   ;;  %s449_s1 = inlined_call_operand.hbm [shape: f32[16,128], index: 1, kind: output, shape index: {}]  }
   0x1   :  { %7 = vsyncpa [#allocation4], 0 }
   0x2   :  { %9 = vsyncpa [#allocation4 + $0x1], 0  ;;  %s348_s6 = smov 0   ;;  %s350_s7 = smov 0  }
   0x3   :  { %s352_s8 = smov 0   ;;  %s354_s9 = smov 0  }
   0x4 LB: > { %s369_s10 = sadd.s32 4294967295, %s334_s9   ;;  %s184_s11 = sadd.s32 4294967294, %s334_s9   ;;  %s334_s9 = sphi %s354_s9, %s457_s9   ;;  %s330_s8 = sphi %s352_s8, %s456_s8   ;;  %s326_s7 = sphi %s350_s7, %s455_s7   ;;  %s322_s6 = sphi %s348_s6, %s454_s6  }
   0x5   : > { %s373_s12 = sadd.s32 1, %s334_s9   ;;  %s43_s13 = sadd.s32 1, %s330_s8 }
   0x6   : > { %s40_s14 = ssub.s32 %s334_s9, %s373_s12  ;;  %p53_p0 = scmp.ne.s32.totalorder %s330_s8, %s326_s7 }
   0x7   : > { %p41_p1 = scmp.eq.s32.totalorder %s40_s14, 0  ;;  %p54_p2 = scmp.eq.s32.totalorder %s369_s10, 1 }
   0x8   : > { %p59_p3 = scmp.ne.s32.totalorder %s326_s7, %s322_s6  ;;  %p60_p4 = scmp.eq.s32.totalorder %s184_s11, 1 }
   0x9   : > { %s384_s15 = scalar_select %p41_p1, %s330_s8, %s43_s13  }
   0xa   : > { %p386_p5 = por %p54_p2, %p53_p0  ;;  %p390_p6 = por %p60_p4, %p59_p3 }
   0xb   : > { %p185_p7 = scmp.ge.s32.totalorder %s334_s9, 1  ;;  %p67_p8 = scmp.lt.s32.totalorder %s334_s9, 3 }
   0xc   : > { %s451_s17 = scalar_select %p390_p6, 1, 0 }
   0xd   : > { %p208_p9 = scmp.eq.s32.totalorder %s369_s10, 0  ;;  %p397_p10 = pnand %p185_p7, %p67_p8 }
   0xe   : > { %s336_s19 = smov [#allocation2]  }
   0xf   : > { %s80_s20 = sshll.u32 %s336_s19, 4  ;;  %p200_p11 = pneg %p397_p10  ;;  %s81_s20 = int_to_ptr.vmem [resolvable:$true] %s80_s20 }
  0x10   : > { %s255_s21 = scalar_lea.vmem %s81_s20, 128  ;;  %p263_p3 = scmp.lt.s32.totalorder %s81_s20, %s81_s20 }
  0x11   : > { %p201_p12 = pnand %p208_p9, %p200_p11  ;;  %p256_p0 = scmp.ne.s32.totalorder %s81_s20, %s255_s21 }
  0x12   : > { %p264_p4 = scmp.lt.s32.totalorder %s255_s21, %s255_s21 }
  0x13   : > { %p246_p13 = pneg %p201_p12 }
  0x14   : > { %p265_p6 = por %p264_p4, %p263_p3 }
  0x15   : > { %p258_p1 = pnand %p256_p0, %p246_p13 }
  0x17   : > { %p259_p2 = pneg %p258_p1 }
  0x19   : > { %p266_p7 = pnand %p265_p6, %p259_p2 }
  0x1b   : > { %269 = shalt.err (!%p266_p7)
}
  0x1c   : > { %203 = dma.hbm_to_vmem [thread:$0]  (!%p201_p12), %s448_s0, 128, %s81_s20, [#allocation3]  }
  0x1d   : > { %93 = sbr.rel (%p397_p10) target bundleno = 60 (0x3c), region = 24 }
  0x22   : > { %313 = dma.done.wait (%p208_p9), [#allocation3], 128  }
  0x23   : > { %315 = vsyncadd (%p208_p9), [#allocation3], 4294967168  ;;  %s105_s24 = sand.u32 1, %s326_s7   ;;  %s191_s28 = sshll.u32 %s369_s10, 7  ;;  %v108_v0 = vld [vmem:[#allocation2] sm:$0xff] }
  0x24   : > { %s189_s25 = sshll.u32 %s105_s24, 3  ;;  %v109_v1 = vadd.f32 1.0, %v108_v0  ;;  %s123_s2 = scalar_lea.hbm %s449_s1, %s191_s28 }
  0x25   : > { %s107_s26 = scalar_lea.vmem [#allocation5], %s189_s25  ;;  %s112_s3 = scalar_lea.sflag [#allocation4], %s105_s24 }
  0x26   : > { %s125_s27 = sshll.u32 %s107_s26, 4  ;;  %110 = vst [vmem:[%s107_s26] sm:$0xff] %v109_v1  ;;  %s337_s5 = smov [#allocation5]   ;;  %s126_s27 = int_to_ptr.vmem [resolvable:$true] %s125_s27 }
  0x27   : > { %s270_s4 = scalar_lea.vmem %s126_s27, 128  ;;  %s274_s11 = sshll.u32 %s337_s5, 4  ;;  %s275_s11 = int_to_ptr.vmem [resolvable:$false] %s274_s11 }
  0x28   : > { %p271_p6 = scmp.ne.s32.totalorder %s126_s27, %s270_s4  ;;  %s276_s13 = scalar_lea.vmem %s275_s11, 256 }
  0x29   : > { %p277_p10 = scmp.lt.s32.totalorder %s126_s27, %s275_s11  ;;  %p278_p11 = scmp.lt.s32.totalorder %s276_s13, %s270_s4 }
  0x2a   : > { %p272_p8 = pnand %p271_p6, %p386_p5 }
  0x2b   : > { %p279_p12 = por %p278_p11, %p277_p10 }
  0x2c   : > { %p273_p9 = pneg %p272_p8 }
  0x2e   : > { %p280_p13 = pnand %p279_p12, %p273_p9 }
  0x30   : > { %283 = shalt.err (!%p280_p13)
}
  0x31   : > { %s284_s10 = scalar_lea.hbm %s123_s2, 128  ;;  %s288_s19 = scalar_lea.hbm %s449_s1, 256 }
  0x32   : > { %p285_p0 = scmp.ne.s32.totalorder %s123_s2, %s284_s10  ;;  %p289_p3 = scmp.lt.s32.totalorder %s123_s2, %s449_s1 }
  0x33   : > { %p290_p4 = scmp.lt.s32.totalorder %s288_s19, %s284_s10 }
  0x34   : > { %p286_p1 = pnand %p285_p0, %p386_p5 }
  0x35   : > { %p291_p7 = por %p290_p4, %p289_p3 }
  0x36   : > { %p287_p2 = pneg %p286_p1 }
  0x38   : > { %p292_p6 = pnand %p291_p7, %p287_p2 }
  0x3a   : > { %295 = shalt.err (!%p292_p6)
}
  0x3b   : > { %198 = dma.vmem_to_hbm [thread:$0]  (%p386_p5), %s126_s27, 128, %s123_s2, %s112_s3  }
  0x3c PF: > { %p210_p8 = scmp.ge.s32.totalorder %s334_s9, 2  ;;  %s137_s22 = sand.u32 1, %s322_s6  }
  0x3d   : > { %p453_p9 = scmp.ne.s32.totalorder %s451_s17, 0  ;;  %s138_s23 = scalar_lea.sflag [#allocation4], %s137_s22 }
  0x3f   : > { %p205_p10 = pnand %p210_p8, %p453_p9 }
  0x41   : > { %p206_p11 = pneg %p205_p10 }
  0x43   : > { %317 = dma.done.wait (%p206_p11), %s138_s23, 128  }
  0x44   : > { %319 = vsyncadd (%p206_p11), %s138_s23, 4294967168  ;;  %p12_p12 = scmp.ge.s32.totalorder %s373_s12, 4   ;;  %s454_s6 = smov %s326_s7 }
  0x45   : > { %s455_s7 = smov %s330_s8  ;;  %s456_s8 = smov %s384_s15 }
  0x46   : > { %s457_s9 = smov %s373_s12  ;;  %14 = sbr.rel (!%p12_p12) target bundleno = 4 (0x4), region = 61 }
  0x4b   :  { %143 = vsyncpa [#allocation3], 1 }
  0x4c   :  { %145 = vsyncpa [#allocation3 + $0x1], 1 }
  0x4d   :  { %146 = vsyncpa [#allocation4], 1 }
  0x4e   :  { %148 = vsyncpa [#allocation4 + $0x1], 1 }

// kernel: tpu_custom_call.1
= control target key start
LH: loop header
LB: loop body
LE: loop exit
PB: predicated region body
PF: predicated region fallthrough
CT: control target
= control target key end

     0   :  { %12 = vsyncpa [#allocation3], 0  ;;  %s810_s0 = inlined_call_operand.hbm [shape: f32[8,128], index: 0, kind: input, shape index: {}]   ;;  %s811_s1 = inlined_call_operand.hbm [shape: f32[128,128], index: 1, kind: input, shape index: {}]   ;;  %s812_s2 = inlined_call_operand.vmem [shape: f32[1,128], index: 2, kind: input, shape index: {}]   ;;  %s813_s3 = inlined_call_operand.hbm [shape: f32[128,128], index: 3, kind: input, shape index: {}]   ;;  %s814_s4 = inlined_call_operand.vmem [shape: f32[1,128], index: 4, kind: input, shape index: {}]   ;;  %s815_s5 = inlined_call_operand.hbm [shape: f32[128,128], index: 5, kind: input, shape index: {}]   ;;  %s816_s6 = inlined_call_operand.vmem [shape: f32[1,128], index: 6, kind: input, shape index: {}]   ;;  %s817_s7 = inlined_call_operand.hbm [shape: f32[8,128], index: 7, kind: output, shape index: {}]  }
   0x1   :  { %13 = vsyncpa [#allocation6], 0 }
   0x2   :  { %14 = vsyncpa [#allocation9], 0 }
   0x3   :  { %15 = vsyncpa [#allocation4], 0  ;;  %s674_s24 = smov [#allocation5]  }
   0x4   :  { %s31_s25 = sshll.u32 %s674_s24, 4  ;;  %s32_s25 = int_to_ptr.vmem [resolvable:$true] %s31_s25 }
   0x5   :  { %s574_s26 = scalar_lea.vmem %s32_s25, 2048  ;;  %p579_p1 = scmp.lt.s32.totalorder %s32_s25, %s32_s25 }
   0x6   :  { %p575_p0 = scmp.ne.s32.totalorder %s32_s25, %s574_s26  ;;  %p580_p2 = scmp.lt.s32.totalorder %s574_s26, %s574_s26 }
   0x8   :  { %p581_p3 = por %p580_p2, %p579_p1 }
   0xa   :  { %p582_p4 = pnand %p581_p3, %p575_p0 }
   0xc   :  { %585 = shalt.err (!%p582_p4)
}
   0xd   :  { %s675_s27 = smov 128   ;;  %s676_s28 = smov 8  }
   0xe   :  { %37 = dma.hbm_to_vmem [thread:$0]  %s811_s1, 2048, %s32_s25, [#allocation6], %s675_s27, %s675_s27, %s676_s28  }
   0xf   :  { %s677_s8 = smov [#allocation2]   ;;  %s678_s10 = smov [#allocation7]  }
  0x10   :  { %s22_s9 = sshll.u32 %s677_s8, 4  ;;  %s45_s11 = sshll.u32 %s678_s10, 4  ;;  %s23_s9 = int_to_ptr.vmem [resolvable:$true] %s22_s9  ;;  %s46_s11 = int_to_ptr.vmem [resolvable:$true] %s45_s11 }
  0x11   :  { %s594_s12 = scalar_lea.vmem %s23_s9, 128  ;;  %p599_p6 = scmp.lt.s32.totalorder %s23_s9, %s23_s9 }
  0x12   :  { %p595_p5 = scmp.ne.s32.totalorder %s23_s9, %s594_s12  ;;  %p600_p7 = scmp.lt.s32.totalorder %s594_s12, %s594_s12 }
  0x14   :  { %p601_p8 = por %p600_p7, %p599_p6 }
  0x16   :  { %p602_p9 = pnand %p601_p8, %p595_p5 }
  0x18   :  { %605 = shalt.err (!%p602_p9)
}
  0x19   :  { %25 = dma.hbm_to_vmem [thread:$0]  %s810_s0, 128, %s23_s9, [#allocation3]  }
  0x1a   :  { %s614_s15 = scalar_lea.vmem %s46_s11, 2048  ;;  %p619_p11 = scmp.lt.s32.totalorder %s46_s11, %s46_s11 }
  0x1b   :  { %p615_p10 = scmp.ne.s32.totalorder %s46_s11, %s614_s15  ;;  %p620_p12 = scmp.lt.s32.totalorder %s614_s15, %s614_s15 }
  0x1d   :  { %p621_p13 = por %p620_p12, %p619_p11 }
  0x1f   :  { %p622_p0 = pnand %p621_p13, %p615_p10 }
  0x21   :  { %625 = shalt.err (!%p622_p0)
}
  0x22   :  { %51 = dma.hbm_to_vmem [thread:$0]  %s813_s3, 2048, %s46_s11, [#allocation6], %s675_s27, %s675_s27, %s676_s28  }
  0x23   :  { %s679_s17 = smov [#allocation8]  }
  0x24   :  { %s59_s18 = sshll.u32 %s679_s17, 4  ;;  %s60_s18 = int_to_ptr.vmem [resolvable:$true] %s59_s18 }
  0x25   :  { %s634_s19 = scalar_lea.vmem %s60_s18, 2048  ;;  %p639_p2 = scmp.lt.s32.totalorder %s60_s18, %s60_s18 }
  0x26   :  { %p635_p1 = scmp.ne.s32.totalorder %s60_s18, %s634_s19  ;;  %p640_p3 = scmp.lt.s32.totalorder %s634_s19, %s634_s19 }
  0x28   :  { %p641_p4 = por %p640_p3, %p639_p2 }
  0x2a   :  { %p642_p5 = pnand %p641_p4, %p635_p1 }
  0x2c   :  { %645 = shalt.err (!%p642_p5)
}
  0x2d   :  { %65 = dma.hbm_to_vmem [thread:$0]  %s815_s5, 2048, %s60_s18, [#allocation9], %s675_s27, %s675_s27, %s676_s28  }
  0x2e   :  { %666 = dma.done.wait [#allocation3], 128  }
  0x2f   :  { %667 = vsyncadd [#allocation3], 4294967168 }
  0x30   :  { %668 = dma.done.wait [#allocation6], 4096  }
  0x31   :  { %669 = vsyncadd [#allocation6], 4294963200 }
  0x32   :  { %670 = dma.done.wait [#allocation9], 2048  }
  0x33   :  { %671 = vsyncadd [#allocation9], 4294965248  ;;  %v680_v0 = vmov 0.0   ;;  %vm681_vm0 = vmmov 0   ;;  %v96_v1 = vld [vmem:[#allocation5 + $0x78] sm:$0xff]  ;;  %v95_v2 = vld [vmem:[#allocation5 + $0x70] sm:$0xff] }
  0x34   :  { %444 = vmatprep.subr.mxu0 %v680_v0  ;;  %476 = vmatprep.mubr.msk.f32.mxu0 %vm681_vm0, %v680_v0  ;;  %v94_v3 = vld [vmem:[#allocation5 + $0x68] sm:$0xff]  ;;  %v93_v4 = vld [vmem:[#allocation5 + $0x60] sm:$0xff]  ;;  %v92_v5 = vld [vmem:[#allocation5 + $0x58] sm:$0xff]  ;;  %s682_s24 = smov [#allocation10]  }
  0x35   :  { %479 = vmatprep.subr.mxu1 %v680_v0  ;;  %511 = vmatprep.mubr.msk.f32.mxu1 %vm681_vm0, %v680_v0  ;;  %v91_v6 = vld [vmem:[#allocation5 + $0x50] sm:$0xff]  ;;  %v90_v7 = vld [vmem:[#allocation5 + $0x48] sm:$0xff]  ;;  %v89_v8 = vld [vmem:[#allocation5 + $0x40] sm:$0xff]  ;;  %s379_s25 = sshll.u32 %s682_s24, 4  ;;  %s380_s25 = int_to_ptr.vmem [resolvable:$true] %s379_s25 }
  0x36   :  { %445 = vmatpush3.msra.mxu0 %v96_v1  ;;  %v88_v9 = vld [vmem:[#allocation5 + $0x38] sm:$0xff]  ;;  %v87_v10 = vld [vmem:[#allocation5 + $0x30] sm:$0xff]  ;;  %v86_v11 = vld [vmem:[#allocation5 + $0x28] sm:$0xff]  ;;  %p651_p7 = scmp.lt.s32.totalorder %s380_s25, %s380_s25 }
  0x37   :  { %446 = vmatprep.subr.mxu0 %v680_v0  ;;  %v85_v12 = vld [vmem:[#allocation5 + $0x20] sm:$0xff]  ;;  %v84_v13 = vld [vmem:[#allocation5 + $0x18] sm:$0xff]  ;;  %v83_v14 = vld [vmem:[#allocation5 + $0x10] sm:$0xff] }
  0x38   :  { %447 = vmatpush3.msra.mxu0 %v95_v2  ;;  %v82_v15 = vld [vmem:[#allocation5 + $0x8] sm:$0xff]  ;;  %v81_v16 = vld [vmem:[#allocation5] sm:$0xff]  ;;  %v80_v17 = vld [vmem:[#allocation2] sm:$0xff] }
  0x39   :  { %448 = vmatprep.subr.mxu0 %v680_v0  ;;  %v195_v18 = vld [vmem:[#allocation7 + $0x78] sm:$0xff]  ;;  %v194_v19 = vld [vmem:[#allocation7 + $0x70] sm:$0xff]  ;;  %v193_v20 = vld [vmem:[#allocation7 + $0x68] sm:$0xff] }
  0x3a   :  { %449 = vmatpush3.msra.mxu0 %v94_v3  ;;  %480 = vmatpush3.msra.mxu1 %v195_v18  ;;  %v192_v21 = vld [vmem:[#allocation7 + $0x60] sm:$0xff]  ;;  %v191_v22 = vld [vmem:[#allocation7 + $0x58] sm:$0xff]  ;;  %v190_v23 = vld [vmem:[#allocation7 + $0x50] sm:$0xff] }
  0x3b   :  { %450 = vmatprep.subr.mxu0 %v680_v0  ;;  %481 = vmatprep.subr.mxu1 %v680_v0  ;;  %v189_v24 = vld [vmem:[#allocation7 + $0x48] sm:$0xff]  ;;  %v188_v25 = vld [vmem:[#allocation7 + $0x40] sm:$0xff]  ;;  %v187_v26 = vld [vmem:[#allocation7 + $0x38] sm:$0xff] }
  0x3c   :  { %451 = vmatpush3.msra.mxu0 %v93_v4  ;;  %482 = vmatpush3.msra.mxu1 %v194_v19  ;;  %v186_v27 = vld [vmem:[#allocation7 + $0x30] sm:$0xff]  ;;  %v185_v28 = vld [vmem:[#allocation7 + $0x28] sm:$0xff]  ;;  %v184_v29 = vld [vmem:[#allocation7 + $0x20] sm:$0xff] }
  0x3d   :  { %452 = vmatprep.subr.mxu0 %v680_v0  ;;  %483 = vmatprep.subr.mxu1 %v680_v0  ;;  %v183_v30 = vld [vmem:[#allocation7 + $0x18] sm:$0xff]  ;;  %v182_v31 = vld [vmem:[#allocation7 + $0x10] sm:$0xff]  ;;  %v181_v32 = vld [vmem:[#allocation7 + $0x8] sm:$0xff] }
  0x3e   :  { %453 = vmatpush3.msra.mxu0 %v92_v5  ;;  %484 = vmatpush3.msra.mxu1 %v193_v20  ;;  %v180_v33 = vld [vmem:[#allocation7] sm:$0xff]  ;;  %v390_v34 = vld [vmem:[%s812_s2] ss:$0 sm:$0xff]  ;;  %v293_v45 = vld [vmem:[#allocation8 + $0x70] sm:$0xff] }
  0x3f   :  { %454 = vmatprep.subr.mxu0 %v680_v0  ;;  %485 = vmatprep.subr.mxu1 %v680_v0  ;;  %v294_v44 = vld [vmem:[#allocation8 + $0x78] sm:$0xff]  ;;  %v292_v46 = vld [vmem:[#allocation8 + $0x68] sm:$0xff]  ;;  %v291_v47 = vld [vmem:[#allocation8 + $0x60] sm:$0xff] }
  0x40   :  { %455 = vmatpush3.msra.mxu0 %v91_v6  ;;  %486 = vmatpush3.msra.mxu1 %v192_v21  ;;  %v290_v48 = vld [vmem:[#allocation8 + $0x58] sm:$0xff]  ;;  %v289_v49 = vld [vmem:[#allocation8 + $0x50] sm:$0xff]  ;;  %v288_v50 = vld [vmem:[#allocation8 + $0x48] sm:$0xff] }
  0x41   :  { %456 = vmatprep.subr.mxu0 %v680_v0  ;;  %487 = vmatprep.subr.mxu1 %v680_v0  ;;  %v287_v51 = vld [vmem:[#allocation8 + $0x40] sm:$0xff]  ;;  %v286_v52 = vld [vmem:[#allocation8 + $0x38] sm:$0xff]  ;;  %v285_v53 = vld [vmem:[#allocation8 + $0x30] sm:$0xff] }
  0x42   :  { %457 = vmatpush3.msra.mxu0 %v90_v7  ;;  %488 = vmatpush3.msra.mxu1 %v191_v22  ;;  %v284_v54 = vld [vmem:[#allocation8 + $0x28] sm:$0xff]  ;;  %v283_v55 = vld [vmem:[#allocation8 + $0x20] sm:$0xff]  ;;  %v282_v56 = vld [vmem:[#allocation8 + $0x18] sm:$0xff] }
  0x43   :  { %458 = vmatprep.subr.mxu0 %v680_v0  ;;  %489 = vmatprep.subr.mxu1 %v680_v0  ;;  %v281_v57 = vld [vmem:[#allocation8 + $0x10] sm:$0xff]  ;;  %v280_v58 = vld [vmem:[#allocation8 + $0x8] sm:$0xff]  ;;  %v279_v59 = vld [vmem:[#allocation8] sm:$0xff] }
  0x44   :  { %459 = vmatpush3.msra.mxu0 %v89_v8  ;;  %490 = vmatpush3.msra.mxu1 %v190_v23  ;;  %v391_v60 = vld [vmem:[%s814_s4] ss:$0 sm:$0xff]  ;;  %s646_s4 = scalar_lea.vmem %s380_s25, 128 }
  0x45   :  { %460 = vmatprep.subr.mxu0 %v680_v0  ;;  %491 = vmatprep.subr.mxu1 %v680_v0  ;;  %p647_p6 = scmp.ne.s32.totalorder %s380_s25, %s646_s4  ;;  %p652_p8 = scmp.lt.s32.totalorder %s646_s4, %s646_s4 }
  0x46   :  { %461 = vmatpush3.msra.mxu0 %v88_v9  ;;  %492 = vmatpush3.msra.mxu1 %v189_v24 }
  0x47   :  { %462 = vmatprep.subr.mxu0 %v680_v0  ;;  %493 = vmatprep.subr.mxu1 %v680_v0  ;;  %p653_p9 = por %p652_p8, %p651_p7 }
  0x48   :  { %463 = vmatpush3.msra.mxu0 %v87_v10  ;;  %494 = vmatpush3.msra.mxu1 %v188_v25 }
  0x49   :  { %464 = vmatprep.subr.mxu0 %v680_v0  ;;  %495 = vmatprep.subr.mxu1 %v680_v0  ;;  %p654_p10 = pnand %p653_p9, %p647_p6 }
  0x4a   :  { %465 = vmatpush3.msra.mxu0 %v86_v11  ;;  %496 = vmatpush3.msra.mxu1 %v187_v26 }
  0x4b   :  { %466 = vmatprep.subr.mxu0 %v680_v0  ;;  %497 = vmatprep.subr.mxu1 %v680_v0 }
  0x4c   :  { %467 = vmatpush3.msra.mxu0 %v85_v12  ;;  %498 = vmatpush3.msra.mxu1 %v186_v27 }
  0x4d   :  { %468 = vmatprep.subr.mxu0 %v680_v0  ;;  %499 = vmatprep.subr.mxu1 %v680_v0 }
  0x4e   :  { %469 = vmatpush3.msra.mxu0 %v84_v13  ;;  %500 = vmatpush3.msra.mxu1 %v185_v28 }
  0x4f   :  { %470 = vmatprep.subr.mxu0 %v680_v0  ;;  %501 = vmatprep.subr.mxu1 %v680_v0 }
  0x50   :  { %471 = vmatpush3.msra.mxu0 %v83_v14  ;;  %502 = vmatpush3.msra.mxu1 %v184_v29 }
  0x51   :  { %472 = vmatprep.subr.mxu0 %v680_v0  ;;  %503 = vmatprep.subr.mxu1 %v680_v0 }
  0x52   :  { %473 = vmatpush3.msra.mxu0 %v82_v15  ;;  %504 = vmatpush3.msra.mxu1 %v183_v30 }
  0x53   :  { %474 = vmatprep.subr.mxu0 %v680_v0  ;;  %505 = vmatprep.subr.mxu1 %v680_v0 }
  0x54   :  { %475 = vmatpush3.msra.mxu0 %v81_v16  ;;  %506 = vmatpush3.msra.mxu1 %v182_v31 }
  0x55   :  { %477 = vmatmul.mubr.f32.vlgmr.msra.gmra.mxu0 %v80_v17  ;;  %514 = vmatprep.subr.mxu0 %v680_v0 }
  0x56   :  { %546 = vmatprep.mubr.msk.f32.mxu0 %vm681_vm0, %v680_v0  ;;  %507 = vmatprep.subr.mxu1 %v680_v0 }
  0x57   :  { %508 = vmatpush3.msra.mxu1 %v181_v32  ;;  %515 = vmatpush3.msra.mxu0 %v294_v44 }
  0x58   :  { %509 = vmatprep.subr.mxu1 %v680_v0  ;;  %516 = vmatprep.subr.mxu0 %v680_v0 }
  0x59   :  { %510 = vmatpush3.msra.mxu1 %v180_v33  ;;  %517 = vmatpush3.msra.mxu0 %v293_v45 }
  0x5a   :  { %518 = vmatprep.subr.mxu0 %v680_v0 }
  0x5b   :  { %519 = vmatpush3.msra.mxu0 %v292_v46 }
  0x5c   :  { %520 = vmatprep.subr.mxu0 %v680_v0 }
  0x5d   :  { %521 = vmatpush3.msra.mxu0 %v291_v47 }
  0x5e   :  { %522 = vmatprep.subr.mxu0 %v680_v0 }
  0x5f   :  { %523 = vmatpush3.msra.mxu0 %v290_v48 }
  0x60   :  { %524 = vmatprep.subr.mxu0 %v680_v0 }
  0x61   :  { %525 = vmatpush3.msra.mxu0 %v289_v49 }
  0x62   :  { %526 = vmatprep.subr.mxu0 %v680_v0 }
  0x63   :  { %527 = vmatpush3.msra.mxu0 %v288_v50 }
  0x64   :  { %528 = vmatprep.subr.mxu0 %v680_v0 }
  0x65   :  { %529 = vmatpush3.msra.mxu0 %v287_v51 }
  0x66   :  { %530 = vmatprep.subr.mxu0 %v680_v0 }
  0x67   :  { %531 = vmatpush3.msra.mxu0 %v286_v52 }
  0x68   :  { %532 = vmatprep.subr.mxu0 %v680_v0 }
  0x69   :  { %533 = vmatpush3.msra.mxu0 %v285_v53 }
  0x6a   :  { %534 = vmatprep.subr.mxu0 %v680_v0 }
  0x6b   :  { %535 = vmatpush3.msra.mxu0 %v284_v54 }
  0x6c   :  { %536 = vmatprep.subr.mxu0 %v680_v0 }
  0x6d   :  { %537 = vmatpush3.msra.mxu0 %v283_v55 }
  0x6e   :  { %538 = vmatprep.subr.mxu0 %v680_v0 }
  0x6f   :  { %539 = vmatpush3.msra.mxu0 %v282_v56 }
  0x70   :  { %540 = vmatprep.subr.mxu0 %v680_v0 }
  0x71   :  { %541 = vmatpush3.msra.mxu0 %v281_v57 }
  0x72   :  { %542 = vmatprep.subr.mxu0 %v680_v0 }
  0x73   :  { %543 = vmatpush3.msra.mxu0 %v280_v58 }
  0x74   :  { %544 = vmatprep.subr.mxu0 %v680_v0  ;;  %v392_v0 = vld [vmem:[%s816_s6] ss:$0 sm:$0xff] }
  0x75   :  { %545 = vmatpush3.msra.mxu0 %v279_v59 }
 0x115   :  { %v170_v35 = vpop.f32.mrf.mxu0 }
 0x116   :  { %v171_v36 = vadd.f32 %v390_v34, %v170_v35 }
 0x117   :  { %v478_v37 = vpop.f32.mrf.mxu0 }
 0x118   :  { %v174_v38 = vsub.f32 0.0, %v171_v36 }
 0x11a   :  { %v175_v39 = vmul.f32 1.442695, %v174_v38 }
 0x11c   :  { %558 = vpow2.f32 %v175_v39 }
 0x129   :  { %v559_v40 = vpop.eup %558 }
 0x12a   :  { %v177_v41 = vadd.f32 1.0, %v559_v40 }
 0x12c   :  { %560 = vrcp.f32 %v177_v41 }
 0x139   :  { %v561_v42 = vpop.eup %560 }
 0x13a   :  { %v179_v43 = vmul.f32 %v561_v42, %v171_v36 }
 0x13c   :  { %512 = vmatmul.mubr.f32.vlgmr.msra.gmra.mxu1 %v179_v43 }
 0x1fc   :  { %v269_v61 = vpop.f32.mrf.mxu1 }
 0x1fd   :  { %v270_v62 = vadd.f32 %v391_v60, %v269_v61 }
 0x1fe   :  { %v513_v63 = vpop.f32.mrf.mxu1 }
 0x1ff   :  { %v273_v1 = vsub.f32 0.0, %v270_v62 }
 0x201   :  { %v274_v2 = vmul.f32 1.442695, %v273_v1 }
 0x203   :  { %562 = vpow2.f32 %v274_v2 }
 0x210   :  { %v563_v3 = vpop.eup %562 }
 0x211   :  { %v276_v4 = vadd.f32 1.0, %v563_v3 }
 0x213   :  { %564 = vrcp.f32 %v276_v4 }
 0x220   :  { %v565_v5 = vpop.eup %564 }
 0x221   :  { %v278_v6 = vmul.f32 %v565_v5, %v270_v62 }
 0x223   :  { %547 = vmatmul.mubr.f32.vlgmr.msra.gmra.mxu0 %v278_v6 }
 0x2e3   :  { %v368_v7 = vpop.f32.mrf.mxu0 }
 0x2e4   :  { %v369_v8 = vadd.f32 %v392_v0, %v368_v7 }
 0x2e5   :  { %v548_v9 = vpop.f32.mrf.mxu0 }
 0x2e6   :  { %372 = vst [vmem:[#allocation10] sm:$0xff] %v369_v8 }
 0x2e7   :  { %657 = shalt.err (!%p654_p10)
}
 0x2e8   :  { %382 = dma.vmem_to_hbm [thread:$0]  %s380_s25, 128, %s817_s7, [#allocation4]  }
 0x2e9   :  { %672 = dma.done.wait [#allocation4], 128  }
 0x2ea   :  { %673 = vsyncadd [#allocation4], 4294967168 }
 0x2eb   :  { %386 = vsyncpa [#allocation3], 1 }
 0x2ec   :  { %387 = vsyncpa [#allocation6], 1 }
 0x2ed   :  { %388 = vsyncpa [#allocation9], 1 }
 0x2ee   :  { %389 = vsyncpa [#allocation4], 1 }

</bundles_post_ra>
